<compile_context>
chip_gen: v6e
topology: v6e:2x2x1
jax: 0.10.0
libtpu: 0.0.40
codegen_flags: <defaults>
</compile_context>

<pallas_src>
import functools

import jax
import jax.numpy as jnp
from jax import lax
from jax.experimental import pallas as pl
from jax.experimental.pallas import tpu as pltpu

NUM_CYCLES = 10                      # hard-coded `range(10)` in the reference
ROT_ROW0 = 3 * NUM_CYCLES            # first rotation-euler-diff row in the slab
_LANE = 128


def _round_up(x, m):
    return ((x + m - 1) // m) * m


# --------------------- lane-dense (batch-minor) XLA prep ---------------------

def _euler_to_matrix_channels(ex, ey, ez):
    """Euler channels (x,y,z) -> 9 rotation-matrix channels, ZYX: R = Rz@Ry@Rx.
    All inputs/outputs share the same (batch-minor) shape."""
    cx, sx = jnp.cos(ex), jnp.sin(ex)
    cy, sy = jnp.cos(ey), jnp.sin(ey)
    cz, sz = jnp.cos(ez), jnp.sin(ez)
    return (cz * cy, cz * sy * sx - sz * cx, cz * sy * cx + sz * sx,
            sz * cy, sz * sy * sx + cz * cx, sz * sy * cx - cz * sx,
            -sy,     cy * sx,                cy * cx)


def _matmul33_channels(a, b):
    """3x3 matrix product on row-major 9-tuples of (B,)-shaped channel arrays."""
    out = []
    for i in range(3):
        for j in range(3):
            out.append(a[3 * i + 0] * b[0 + j] +
                       a[3 * i + 1] * b[3 + j] +
                       a[3 * i + 2] * b[6 + j])
    return tuple(out)


def _matrix_to_euler_channels(m):
    """9 rotation-matrix channels -> (x, y, z) euler channels (ZYX inverse)."""
    r00, r01, r02, r10, r11, r12, r20, r21, r22 = m
    sy = jnp.sqrt(r00 * r00 + r10 * r10)
    singular = sy < 1e-6
    x = jnp.where(singular, jnp.arctan2(-r12, r11), jnp.arctan2(r21, r22))
    y = jnp.arctan2(-r20, sy)
    z = jnp.where(singular, jnp.zeros_like(sy), jnp.arctan2(r10, r00))
    return x, y, z


def _cycle_euler_channels(r):
    """r: (NUM_CYCLES, 3, B) euler rotations (batch on lanes).
    Returns (NUM_CYCLES*3, B): chained cycle rotations converted back to euler.
    R_cyc[0] = E(r_1);  R_cyc[i] = R_cyc[i-1] @ E(r_{i-1})  (matches reference)."""
    E = [_euler_to_matrix_channels(r[k, 0], r[k, 1], r[k, 2])
         for k in range(NUM_CYCLES - 1)]              # only E_0..E_8 are ever used
    cur = E[1]
    cyc = [cur]
    for k in range(NUM_CYCLES - 1):                   # unrolled: k = 0..8
        cur = _matmul33_channels(cur, E[k])
        cyc.append(cur)
    eulers = []
    for m in cyc:
        eulers.extend(_matrix_to_euler_channels(m))
    return jnp.stack(eulers, axis=0)                  # (30, B)


def _prep_diff_slab(pred, gt):
    """pred/gt: (B, 6n) -> (60, B) lane-dense diff slab for the kernel."""
    b = pred.shape[0]

    def split(x):
        xt = x[:, :6 * NUM_CYCLES].astype(jnp.float32).T   # (60, B), batch-minor
        xt = xt.reshape(NUM_CYCLES, 6, b)
        return xt[:, 0:3, :], xt[:, 3:6, :]                # t, r: (10, 3, B)

    tp, rp = split(pred)
    tg, rg = split(gt)
    # The cycle translation prefix-sum is linear, so diff before the kernel.
    dt = (tp - tg).reshape(NUM_CYCLES * 3, b)              # (30, B)
    de = _cycle_euler_channels(rp) - _cycle_euler_channels(rg)   # (30, B)
    return jnp.concatenate([dt, de], axis=0)               # (60, B)


# ------------------------------ Pallas kernel --------------------------------

def _cycle_sse_kernel(d_ref, out_ref):
    """One lane tile: translation prefix-accumulation (9 unrolled VPU adds) plus
    one fused squared-error accumulator.  Pure VPU: no MXU, no cross-lane
    reduction (per-lane partials are summed in the wrapper)."""
    dt0 = d_ref[0:3, :]                                    # (3, TILE)
    acc = dt0                                              # cycle 0
    sq = acc * acc
    acc = acc + dt0                                        # cycle 1 (t_0 double-counted)
    sq = sq + acc * acc
    for i in range(2, NUM_CYCLES):                         # cycles 2..9, unrolled
        acc = acc + d_ref[3 * (i - 1):3 * i, :]
        sq = sq + acc * acc
    for i in range(NUM_CYCLES):                            # rotation-euler diffs
        de = d_ref[ROT_ROW0 + 3 * i:ROT_ROW0 + 3 * i + 3, :]
        sq = sq + de * de
    out_ref[0] = sq                                        # (3, TILE) partials


def _cycle_sse(d, *, lane_tile=None):
    """d: (60, B) float32 diff slab -> scalar sum of squared errors."""
    rows, b = d.shape
    if lane_tile is None:
        lane_tile = min(1024, _round_up(b, _LANE))         # lane-dense tile, mult of 128
    b_pad = _round_up(b, lane_tile)
    if b_pad != b:
        d = jnp.pad(d, ((0, 0), (0, b_pad - b)))           # zero lanes contribute 0
    num_tiles = b_pad // lane_tile

    partial = pl.pallas_call(
        _cycle_sse_kernel,
        out_shape=jax.ShapeDtypeStruct((num_tiles, 3, lane_tile), jnp.float32),
        grid_spec=pltpu.PrefetchScalarGridSpec(
            num_scalar_prefetch=0,
            grid=(num_tiles,),
            in_specs=[pl.BlockSpec((rows, lane_tile), lambda j: (0, j))],
            out_specs=pl.BlockSpec((1, 3, lane_tile), lambda j: (j, 0, 0)),
        ),
        compiler_params=pltpu.CompilerParams(
            dimension_semantics=("parallel",),             # megacore split on v7x
            vmem_limit_bytes=32 * 1024 * 1024,
        ),
    )(d)
    return jnp.sum(partial)                                # tiny final reduce in XLA


# ------------------------------- full forward --------------------------------

@functools.partial(jax.jit, static_argnames=("batch_size",))
def cycle_loss(pred, gt, *, batch_size):
    b = pred.shape[0]
    d = _prep_diff_slab(pred, gt)
    sse = _cycle_sse(d)
    n_elems = b * NUM_CYCLES * 2 * 3                       # cycles shape (B, 10, 2, 3)
    return sse / n_elems / batch_size


# ----------------------- pure-JAX reference (checking) -----------------------

def reshape_transforms(x):
    b, t = x.shape
    n = t // 6
    x6 = x[:, : n * 6].reshape(b, n, 6)
    trans = x6[:, :, 0:3].reshape(b, n * 3)
    rot = x6[:, :, 3:6].reshape(b, n * 3)
    return jnp.stack([trans, rot], axis=1)


def euler_to_matrix(e):
    x, y, z = e[..., 0], e[..., 1], e[..., 2]
    cx, sx = jnp.cos(x), jnp.sin(x)
    cy, sy = jnp.cos(y), jnp.sin(y)
    cz, sz = jnp.cos(z), jnp.sin(z)
    r00 = cz * cy
    r01 = cz * sy * sx - sz * cx
    r02 = cz * sy * cx + sz * sx
    r10 = sz * cy
    r11 = sz * sy * sx + cz * cx
    r12 = sz * sy * cx - cz * sx
    r20 = -sy
    r21 = cy * sx
    r22 = cy * cx
    return jnp.stack(
        [jnp.stack([r00, r01, r02], -1),
         jnp.stack([r10, r11, r12], -1),
         jnp.stack([r20, r21, r22], -1)], -2)


def matrix_to_euler(r):
    sy = jnp.sqrt(r[..., 0, 0] ** 2 + r[..., 1, 0] ** 2)
    singular = sy < 1e-6
    x = jnp.where(singular,
                  jnp.arctan2(-r[..., 1, 2], r[..., 1, 1]),
                  jnp.arctan2(r[..., 2, 1], r[..., 2, 2]))
    y = jnp.arctan2(-r[..., 2, 0], sy)
    z = jnp.where(singular, 0.0, jnp.arctan2(r[..., 1, 0], r[..., 0, 0]))
    return jnp.stack([x, y, z], axis=-1)


def _cycle_chain_rotations(rmats):
    init = rmats[:, 1]

    def step(carry, ej):
        new = jnp.einsum("bij,bjk->bik", carry, ej)
        return new, new

    xs = jnp.swapaxes(rmats[:, : NUM_CYCLES - 1], 0, 1)
    _, rest = lax.scan(step, init, xs)
    return jnp.concatenate([init[:, None], jnp.swapaxes(rest, 0, 1)], axis=1)


def cycle_loss_ref(pred, gt, batch_size):
    b = pred.shape[0]

    def cycles(x):
        xr = reshape_transforms(x.astype(jnp.float32))
        n = xr.shape[-1] // 3
        t = xr[:, 0].reshape(b, n, 3)[:, :NUM_CYCLES]
        r = xr[:, 1].reshape(b, n, 3)
        e = matrix_to_euler(_cycle_chain_rotations(euler_to_matrix(r)))
        prefix = jnp.concatenate(
            [jnp.zeros((b, 1, 3), t.dtype),
             jnp.cumsum(t[:, : NUM_CYCLES - 1], axis=1)], axis=1)
        cyc_t = t[:, 0:1] + prefix
        return jnp.stack([cyc_t, e], axis=2)               # (B, 10, 2, 3)

    pc, gc = cycles(pred), cycles(gt)
    return jnp.mean((pc - gc) ** 2) / batch_size


if __name__ == "__main__":
    key = jax.random.PRNGKey(0)
    k1, k2 = jax.random.split(key)
    batch, n_transforms = 2, 10
    transformations = 6 * n_transforms                     # (B, 60)
    pred = 0.5 * jax.random.normal(k1, (batch, transformations), dtype=jnp.float32)
    gt = 0.5 * jax.random.normal(k2, (batch, transformations), dtype=jnp.float32)

    loss = cycle_loss(pred, gt, batch_size=batch)
    jax.block_until_ready(loss)

    ref = cycle_loss_ref(pred, gt, batch)
    assert jnp.allclose(loss, ref, rtol=1e-4, atol=1e-5), (loss, ref)
    print("KERNEL_OK")
</pallas_src>

<mosaic_0001>
module attributes {stable_mosaic.version = 11 : i64} {
  func.func @_cycle_sse_kernel(%arg0: i32, %arg1: memref<60x128xf32, #tpu.memory_space<vmem>>, %arg2: memref<1x3x128xf32, #tpu.memory_space<vmem>>) attributes {dimension_semantics = [#tpu.dimension_semantics<parallel>], iteration_bounds = array<i64: 1>, scalar_prefetch = 0 : i64, scratch_operands = 0 : i64, tpu.core_type = #tpu.core_type<tc>, window_params = [{transform_indices = @transform_0, window_bounds = array<i64: 60, 128>}, {transform_indices = @transform_1, window_bounds = array<i64: 1, 3, 128>}]} {
    %c0 = arith.constant 0 : index
    %c0_0 = arith.constant 0 : index
    %0 = vector.load %arg1[%c0, %c0_0] : memref<60x128xf32, #tpu.memory_space<vmem>>, vector<3x128xf32>
    %1 = arith.mulf %0, %0 : vector<3x128xf32>
    %2 = arith.addf %0, %0 : vector<3x128xf32>
    %3 = arith.mulf %2, %2 : vector<3x128xf32>
    %4 = arith.addf %1, %3 : vector<3x128xf32>
    %c3 = arith.constant 3 : index
    %c0_1 = arith.constant 0 : index
    %5 = vector.load %arg1[%c3, %c0_1] : memref<60x128xf32, #tpu.memory_space<vmem>>, vector<3x128xf32>
    %6 = arith.addf %2, %5 : vector<3x128xf32>
    %7 = arith.mulf %6, %6 : vector<3x128xf32>
    %8 = arith.addf %4, %7 : vector<3x128xf32>
    %c6 = arith.constant 6 : index
    %c0_2 = arith.constant 0 : index
    %9 = vector.load %arg1[%c6, %c0_2] : memref<60x128xf32, #tpu.memory_space<vmem>>, vector<3x128xf32>
    %10 = arith.addf %6, %9 : vector<3x128xf32>
    %11 = arith.mulf %10, %10 : vector<3x128xf32>
    %12 = arith.addf %8, %11 : vector<3x128xf32>
    %c9 = arith.constant 9 : index
    %c0_3 = arith.constant 0 : index
    %13 = vector.load %arg1[%c9, %c0_3] : memref<60x128xf32, #tpu.memory_space<vmem>>, vector<3x128xf32>
    %14 = arith.addf %10, %13 : vector<3x128xf32>
    %15 = arith.mulf %14, %14 : vector<3x128xf32>
    %16 = arith.addf %12, %15 : vector<3x128xf32>
    %c12 = arith.constant 12 : index
    %c0_4 = arith.constant 0 : index
    %17 = vector.load %arg1[%c12, %c0_4] : memref<60x128xf32, #tpu.memory_space<vmem>>, vector<3x128xf32>
    %18 = arith.addf %14, %17 : vector<3x128xf32>
    %19 = arith.mulf %18, %18 : vector<3x128xf32>
    %20 = arith.addf %16, %19 : vector<3x128xf32>
    %c15 = arith.constant 15 : index
    %c0_5 = arith.constant 0 : index
    %21 = vector.load %arg1[%c15, %c0_5] : memref<60x128xf32, #tpu.memory_space<vmem>>, vector<3x128xf32>
    %22 = arith.addf %18, %21 : vector<3x128xf32>
    %23 = arith.mulf %22, %22 : vector<3x128xf32>
    %24 = arith.addf %20, %23 : vector<3x128xf32>
    %c18 = arith.constant 18 : index
    %c0_6 = arith.constant 0 : index
    %25 = vector.load %arg1[%c18, %c0_6] : memref<60x128xf32, #tpu.memory_space<vmem>>, vector<3x128xf32>
    %26 = arith.addf %22, %25 : vector<3x128xf32>
    %27 = arith.mulf %26, %26 : vector<3x128xf32>
    %28 = arith.addf %24, %27 : vector<3x128xf32>
    %c21 = arith.constant 21 : index
    %c0_7 = arith.constant 0 : index
    %29 = vector.load %arg1[%c21, %c0_7] : memref<60x128xf32, #tpu.memory_space<vmem>>, vector<3x128xf32>
    %30 = arith.addf %26, %29 : vector<3x128xf32>
    %31 = arith.mulf %30, %30 : vector<3x128xf32>
    %32 = arith.addf %28, %31 : vector<3x128xf32>
    %c24 = arith.constant 24 : index
    %c0_8 = arith.constant 0 : index
    %33 = vector.load %arg1[%c24, %c0_8] : memref<60x128xf32, #tpu.memory_space<vmem>>, vector<3x128xf32>
    %34 = arith.addf %30, %33 : vector<3x128xf32>
    %35 = arith.mulf %34, %34 : vector<3x128xf32>
    %36 = arith.addf %32, %35 : vector<3x128xf32>
    %c30 = arith.constant 30 : index
    %c0_9 = arith.constant 0 : index
    %37 = vector.load %arg1[%c30, %c0_9] : memref<60x128xf32, #tpu.memory_space<vmem>>, vector<3x128xf32>
    %38 = arith.mulf %37, %37 : vector<3x128xf32>
    %39 = arith.addf %36, %38 : vector<3x128xf32>
    %c33 = arith.constant 33 : index
    %c0_10 = arith.constant 0 : index
    %40 = vector.load %arg1[%c33, %c0_10] : memref<60x128xf32, #tpu.memory_space<vmem>>, vector<3x128xf32>
    %41 = arith.mulf %40, %40 : vector<3x128xf32>
    %42 = arith.addf %39, %41 : vector<3x128xf32>
    %c36 = arith.constant 36 : index
    %c0_11 = arith.constant 0 : index
    %43 = vector.load %arg1[%c36, %c0_11] : memref<60x128xf32, #tpu.memory_space<vmem>>, vector<3x128xf32>
    %44 = arith.mulf %43, %43 : vector<3x128xf32>
    %45 = arith.addf %42, %44 : vector<3x128xf32>
    %c39 = arith.constant 39 : index
    %c0_12 = arith.constant 0 : index
    %46 = vector.load %arg1[%c39, %c0_12] : memref<60x128xf32, #tpu.memory_space<vmem>>, vector<3x128xf32>
    %47 = arith.mulf %46, %46 : vector<3x128xf32>
    %48 = arith.addf %45, %47 : vector<3x128xf32>
    %c42 = arith.constant 42 : index
    %c0_13 = arith.constant 0 : index
    %49 = vector.load %arg1[%c42, %c0_13] : memref<60x128xf32, #tpu.memory_space<vmem>>, vector<3x128xf32>
    %50 = arith.mulf %49, %49 : vector<3x128xf32>
    %51 = arith.addf %48, %50 : vector<3x128xf32>
    %c45 = arith.constant 45 : index
    %c0_14 = arith.constant 0 : index
    %52 = vector.load %arg1[%c45, %c0_14] : memref<60x128xf32, #tpu.memory_space<vmem>>, vector<3x128xf32>
    %53 = arith.mulf %52, %52 : vector<3x128xf32>
    %54 = arith.addf %51, %53 : vector<3x128xf32>
    %c48 = arith.constant 48 : index
    %c0_15 = arith.constant 0 : index
    %55 = vector.load %arg1[%c48, %c0_15] : memref<60x128xf32, #tpu.memory_space<vmem>>, vector<3x128xf32>
    %56 = arith.mulf %55, %55 : vector<3x128xf32>
    %57 = arith.addf %54, %56 : vector<3x128xf32>
    %c51 = arith.constant 51 : index
    %c0_16 = arith.constant 0 : index
    %58 = vector.load %arg1[%c51, %c0_16] : memref<60x128xf32, #tpu.memory_space<vmem>>, vector<3x128xf32>
    %59 = arith.mulf %58, %58 : vector<3x128xf32>
    %60 = arith.addf %57, %59 : vector<3x128xf32>
    %c54 = arith.constant 54 : index
    %c0_17 = arith.constant 0 : index
    %61 = vector.load %arg1[%c54, %c0_17] : memref<60x128xf32, #tpu.memory_space<vmem>>, vector<3x128xf32>
    %62 = arith.mulf %61, %61 : vector<3x128xf32>
    %63 = arith.addf %60, %62 : vector<3x128xf32>
    %c57 = arith.constant 57 : index
    %c0_18 = arith.constant 0 : index
    %64 = vector.load %arg1[%c57, %c0_18] : memref<60x128xf32, #tpu.memory_space<vmem>>, vector<3x128xf32>
    %65 = arith.mulf %64, %64 : vector<3x128xf32>
    %66 = arith.addf %63, %65 : vector<3x128xf32>
    %c0_19 = arith.constant 0 : index
    %c0_20 = arith.constant 0 : index
    %c0_21 = arith.constant 0 : index
    %67 = vector.load %arg2[%c0_19, %c0_20, %c0_21] : memref<1x3x128xf32, #tpu.memory_space<vmem>>, vector<1x3x128xf32>
    %68 = vector.shape_cast %67 : vector<1x3x128xf32> to vector<3x128xf32>
    %69 = vector.shape_cast %66 : vector<3x128xf32> to vector<1x3x128xf32>
    tpu.vector_store %arg2[%c0_19, %c0_20, %c0_21], %69 {strides = array<i32>} : memref<1x3x128xf32, #tpu.memory_space<vmem>>, vector<1x3x128xf32>,
    return
  }
  func.func @transform_0(%arg0: i32) -> (i32, i32) {
    %c0_i32 = arith.constant 0 : i32
    %c0_i32_0 = arith.constant 0 : i32
    return %c0_i32, %arg0 : i32, i32
  }
  func.func @transform_1(%arg0: i32) -> (i32, i32, i32) {
    %c0_i32 = arith.constant 0 : i32
    %c0_i32_0 = arith.constant 0 : i32
    %c0_i32_1 = arith.constant 0 : i32
    return %arg0, %c0_i32, %c0_i32_0 : i32, i32, i32
  }
}

</mosaic_0001>

<bundles_post_ra>
// kernel: sub.75
= control target key start
LH: loop header
LB: loop body
LE: loop exit
PB: predicated region body
PF: predicated region fallthrough
CT: control target
= control target key end

     0   :  { %s34_s0 = inlined_call_operand.vmem [shape: f32[30,2], index: 0, kind: input, shape index: {}]   ;;  %s35_s1 = inlined_call_operand.vmem [shape: f32[30,2], index: 1, kind: input, shape index: {}]   ;;  %s36_s2 = inlined_call_operand.vmem [shape: f32[30,2], index: 2, kind: output, shape index: {}]  }
   0x1   :  { %v3_v0 = vld [vmem:[%s34_s0] sm:$0x3] }
   0x2   :  { %v4_v1 = vld [vmem:[%s35_s1] sm:$0x3] }
   0x3   :  { %v7_v2 = vsub.f32 %v3_v0, %v4_v1 }
   0x5   :  { %9 = vst [vmem:[%s36_s2] sm:$0x3] %v7_v2 }

// kernel: cycle_loss.1
= control target key start
LH: loop header
LB: loop body
LE: loop exit
PB: predicated region body
PF: predicated region fallthrough
CT: control target
= control target key end

     0   :  { %s150_s0 = inlined_call_operand.vmem [shape: f32[60,128], index: 0, kind: input, shape index: {}]   ;;  %s151_s1 = inlined_call_operand.vmem [shape: f32[1,3,128], index: 1, kind: output, shape index: {}]  }
   0x1   :  { %v8_v0 = vld [vmem:[%s150_s0] sm:$0x7]  ;;  %v13_v1 = vld [vmem:[%s150_s0 + $0x3] sm:$0x7]  ;;  %v17_v4 = vld [vmem:[%s150_s0 + $0x6] sm:$0x7] }
   0x2   :  { %v9_v2 = vmul.f32 %v8_v0, %v8_v0  ;;  %v10_v3 = vadd.f32 %v8_v0, %v8_v0  ;;  %v21_v7 = vld [vmem:[%s150_s0 + $0x9] sm:$0x7]  ;;  %v25_v11 = vld [vmem:[%s150_s0 + $0xc] sm:$0x7]  ;;  %v29_v15 = vld [vmem:[%s150_s0 + $0xf] sm:$0x7] }
   0x3   :  { %v33_v19 = vld [vmem:[%s150_s0 + $0x12] sm:$0x7]  ;;  %v37_v23 = vld [vmem:[%s150_s0 + $0x15] sm:$0x7]  ;;  %v41_v27 = vld [vmem:[%s150_s0 + $0x18] sm:$0x7] }
   0x4   :  { %v11_v5 = vmul.f32 %v10_v3, %v10_v3  ;;  %v14_v6 = vadd.f32 %v13_v1, %v10_v3  ;;  %v45_v31 = vld [vmem:[%s150_s0 + $0x1e] sm:$0x7]  ;;  %v48_v35 = vld [vmem:[%s150_s0 + $0x21] sm:$0x7]  ;;  %v51_v39 = vld [vmem:[%s150_s0 + $0x24] sm:$0x7] }
   0x5   :  { %v46_v38 = vmul.f32 %v45_v31, %v45_v31  ;;  %v49_v41 = vmul.f32 %v48_v35, %v48_v35  ;;  %v54_v42 = vld [vmem:[%s150_s0 + $0x27] sm:$0x7]  ;;  %v52_v44 = vmul.f32 %v51_v39, %v51_v39  ;;  %v57_v45 = vld [vmem:[%s150_s0 + $0x2a] sm:$0x7]  ;;  %v60_v48 = vld [vmem:[%s150_s0 + $0x2d] sm:$0x7] }
   0x6   :  { %v12_v8 = vadd.f32 %v11_v5, %v9_v2  ;;  %v15_v9 = vmul.f32 %v14_v6, %v14_v6  ;;  %v18_v10 = vadd.f32 %v17_v4, %v14_v6  ;;  %v55_v47 = vmul.f32 %v54_v42, %v54_v42  ;;  %v63_v51 = vld [vmem:[%s150_s0 + $0x30] sm:$0x7]  ;;  %v66_v54 = vld [vmem:[%s150_s0 + $0x33] sm:$0x7]  ;;  %v69_v57 = vld [vmem:[%s150_s0 + $0x36] sm:$0x7] }
   0x7   :  { %v58_v50 = vmul.f32 %v57_v45, %v57_v45  ;;  %v61_v53 = vmul.f32 %v60_v48, %v60_v48  ;;  %v64_v56 = vmul.f32 %v63_v51, %v63_v51  ;;  %v67_v59 = vmul.f32 %v66_v54, %v66_v54  ;;  %v72_v60 = vld [vmem:[%s150_s0 + $0x39] sm:$0x7] }
   0x8   :  { %v16_v12 = vadd.f32 %v15_v9, %v12_v8  ;;  %v19_v13 = vmul.f32 %v18_v10, %v18_v10  ;;  %v22_v14 = vadd.f32 %v21_v7, %v18_v10  ;;  %v70_v62 = vmul.f32 %v69_v57, %v69_v57 }
   0x9   :  { %v73_v0 = vmul.f32 %v72_v60, %v72_v60 }
   0xa   :  { %v20_v16 = vadd.f32 %v19_v13, %v16_v12  ;;  %v23_v17 = vmul.f32 %v22_v14, %v22_v14  ;;  %v26_v18 = vadd.f32 %v25_v11, %v22_v14 }
   0xc   :  { %v24_v20 = vadd.f32 %v23_v17, %v20_v16  ;;  %v27_v21 = vmul.f32 %v26_v18, %v26_v18  ;;  %v30_v22 = vadd.f32 %v29_v15, %v26_v18 }
   0xe   :  { %v28_v24 = vadd.f32 %v27_v21, %v24_v20  ;;  %v31_v25 = vmul.f32 %v30_v22, %v30_v22  ;;  %v34_v26 = vadd.f32 %v33_v19, %v30_v22 }
  0x10   :  { %v32_v28 = vadd.f32 %v31_v25, %v28_v24  ;;  %v35_v29 = vmul.f32 %v34_v26, %v34_v26  ;;  %v38_v30 = vadd.f32 %v37_v23, %v34_v26 }
  0x12   :  { %v36_v32 = vadd.f32 %v35_v29, %v32_v28  ;;  %v39_v33 = vmul.f32 %v38_v30, %v38_v30  ;;  %v42_v34 = vadd.f32 %v41_v27, %v38_v30 }
  0x14   :  { %v40_v36 = vadd.f32 %v39_v33, %v36_v32  ;;  %v43_v37 = vmul.f32 %v42_v34, %v42_v34 }
  0x16   :  { %v44_v40 = vadd.f32 %v43_v37, %v40_v36 }
  0x18   :  { %v47_v43 = vadd.f32 %v46_v38, %v44_v40 }
  0x1a   :  { %v50_v46 = vadd.f32 %v49_v41, %v47_v43 }
  0x1c   :  { %v53_v49 = vadd.f32 %v52_v44, %v50_v46 }
  0x1e   :  { %v56_v52 = vadd.f32 %v55_v47, %v53_v49 }
  0x20   :  { %v59_v55 = vadd.f32 %v58_v50, %v56_v52 }
  0x22   :  { %v62_v58 = vadd.f32 %v61_v53, %v59_v55 }
  0x24   :  { %v65_v61 = vadd.f32 %v64_v56, %v62_v58 }
  0x26   :  { %v68_v63 = vadd.f32 %v67_v59, %v65_v61 }
  0x28   :  { %v71_v1 = vadd.f32 %v70_v62, %v68_v63 }
  0x2a   :  { %v74_v2 = vadd.f32 %v73_v0, %v71_v1 }
  0x2c   :  { %75 = vst [vmem:[%s151_s1] sm:$0x7] %v74_v2 }

</bundles_post_ra>
